<compile_context>
chip_gen: v7x
topology: tpu7x:2x2x1
jax: 0.10.0
libtpu: 0.0.40
codegen_flags: <defaults>
</compile_context>

<pallas_src>
import functools

import jax
import jax.numpy as jnp
from jax.experimental import pallas as pl
from jax.experimental.pallas import tpu as pltpu

_LANE = 128


def _round_up(x, m):
    return ((x + m - 1) // m) * m


# ---------------------------------------------------------------------------
# Kernel
# ---------------------------------------------------------------------------
def linear_kernel(x_ref, wt_ref, b_ref, o_ref):
    """o = x @ W^T + b for one (batch-tile, class-tile) grid cell.

    x_ref : (tb, D)   streamed batch tile, original dtype (cast here on the VPU,
                      hidden under the MXU -- avoids a wrapper-side astype pass)
    wt_ref: (D, tn)   pre-transposed / zero-padded weight tile (resident or streamed)
    b_ref : (1, tn)   f32 bias tile
    o_ref : (tb, tn)  lane-dense output tile
    """
    w = wt_ref[...]
    acc = jnp.dot(x_ref[...].astype(w.dtype), w, preferred_element_type=jnp.float32)
    o_ref[...] = (acc + b_ref[...]).astype(o_ref.dtype)


# ---------------------------------------------------------------------------
# One-time parameter preprocessing (model-init time, not per forward call)
# ---------------------------------------------------------------------------
def prepare_linear_params(weight, bias, compute_dtype=jnp.bfloat16):
    """Returns (w_t, b_pad):

    w_t   : (input_dim, c_pad)  weight transposed, cast to `compute_dtype`, class
            dim zero-padded up to a multiple of 128 (lane-dense stores).
    b_pad : (1, c_pad) f32 bias, zero-padded the same way.

    Doing this ONCE here removes a full read+transpose+write HBM pass over the
    weight from every forward call.
    """
    C, D = weight.shape
    c_pad = _round_up(C, _LANE)
    w_t = jnp.zeros((D, c_pad), dtype=compute_dtype)
    w_t = w_t.at[:, :C].set(weight.T.astype(compute_dtype))
    b_pad = jnp.zeros((1, c_pad), dtype=jnp.float32)
    b_pad = b_pad.at[:, :C].set(bias.reshape(1, C).astype(jnp.float32))
    return w_t, b_pad


# ---------------------------------------------------------------------------
# Generation-aware tiling plan
# ---------------------------------------------------------------------------
@functools.lru_cache(maxsize=None)
def _vmem_plan():
    """(tile working-set budget, vmem_limit_bytes)."""
    phys = 64 * 1024 * 1024                     # conservative fallback (v7x per-TC)
    try:
        phys = int(pltpu.get_tpu_info().vmem_capacity_bytes)
    except Exception:
        pass
    if phys >= 96 * 1024 * 1024:                # v5e / v6e: 128 MiB physical
        return 48 * 1024 * 1024, 96 * 1024 * 1024
    return 24 * 1024 * 1024, 48 * 1024 * 1024   # v7x: 64 MiB per TensorCore


def _plan_tiles(B, D, c_pad, x_dtype, w_dtype):
    budget, vmem_limit = _vmem_plan()
    x_item = jnp.dtype(x_dtype).itemsize
    w_item = jnp.dtype(w_dtype).itemsize
    out_item = x_item
    sublane = {4: 8, 2: 16, 1: 32}.get(x_item, 8)

    # Class (N) tiling: keep the whole W^T resident (single-buffered) if it fits
    # comfortably; otherwise stream class tiles.  Prefer 512/256-wide tiles
    # (full 256-wide MXU on v6e/v7x); any multiple of 128 is fine on v5e.
    if D * c_pad * w_item + c_pad * 4 <= budget // 3:
        tn, w_buffers = c_pad, 1
    else:
        tn, w_buffers = c_pad, 2
        for cand in (512, 256, 128):
            if c_pad % cand == 0 and c_pad > cand:
                tn = cand
                break

    w_bytes = w_buffers * (D * tn * w_item + tn * 4)

    # Batch (M) tile: biggest candidate whose double-buffered x / out tiles plus
    # the weight working set fit the budget (per-step overhead ~0.35us; 512-1024
    # row tiles reach ~85% of HBM roofline).
    b_cap = max(_round_up(B, sublane), sublane)
    tb = None
    for cand in (2048, 1024, 512, 256, 128, 64, 32, 16, 8):
        if cand % sublane != 0 or cand > b_cap:
            continue
        usage = w_bytes + 2 * cand * D * x_item + 2 * cand * tn * out_item
        if usage <= budget:
            tb = cand
            break
    if tb is None:
        # TODO(synk): add a K (input_dim) grid axis with an f32 VMEM accumulator so
        # extremely large input_dim also fits; not needed for this module's shapes.
        raise ValueError(
            f"LinearClassifier kernel: no batch tile fits VMEM "
            f"(input_dim={D}, padded_classes={c_pad}, budget={budget} bytes).")
    return tb, tn, w_buffers, vmem_limit


# ---------------------------------------------------------------------------
# Forward
# ---------------------------------------------------------------------------
@functools.partial(
    jax.jit, static_argnames=("tb", "tn", "w_buffers", "vmem_limit", "num_classes"))
def _linear_pallas(x, w_t, b_pad, *, tb, tn, w_buffers, vmem_limit, num_classes):
    B, D = x.shape
    _, c_pad = w_t.shape
    grid = (pl.cdiv(B, tb), c_pad // tn)   # class axis innermost -> x tile reused

    if w_buffers == 1:
        # Resident weight / bias: single-buffered (their block index never
        # changes), halving their VMEM footprint vs the default double-buffer.
        w_spec = pl.BlockSpec((D, tn), lambda i, j: (0, j),
                              pipeline_mode=pl.Buffered(1))
        b_spec = pl.BlockSpec((1, tn), lambda i, j: (0, j),
                              pipeline_mode=pl.Buffered(1))
    else:
        w_spec = pl.BlockSpec((D, tn), lambda i, j: (0, j))
        b_spec = pl.BlockSpec((1, tn), lambda i, j: (0, j))

    out = pl.pallas_call(
        linear_kernel,
        out_shape=jax.ShapeDtypeStruct((B, c_pad), x.dtype),
        grid_spec=pltpu.PrefetchScalarGridSpec(
            num_scalar_prefetch=0,
            grid=grid,
            in_specs=[
                pl.BlockSpec((tb, D), lambda i, j: (i, 0)),   # streamed x tiles
                w_spec,                                       # weight tile(s)
                b_spec,                                       # bias tile(s)
            ],
            out_specs=pl.BlockSpec((tb, tn), lambda i, j: (i, j)),
        ),
        compiler_params=pltpu.CompilerParams(
            # All output tiles are independent -> both axes parallel
            # (v7x: shards the grid across both TensorCores).
            dimension_semantics=("parallel", "parallel"),
            vmem_limit_bytes=vmem_limit,
        ),
    )(x, w_t, b_pad)

    # Slice only when the class dim was actually padded (skip the extra HBM pass
    # whenever num_classes is already a multiple of 128).
    if num_classes != c_pad:
        out = out[:, :num_classes]
    return out


def linear_classifier_forward(x, w_t, b_pad, num_classes=None,
                              *, block_batch=None, block_classes=None):
    """Pallas forward equivalent to nn.Linear(input_dim, num_classes).

    `w_t` / `b_pad` come from `prepare_linear_params` (one-time preprocessing).
    """
    B, D = x.shape
    D2, c_pad = w_t.shape
    assert D == D2, "w_t must be (input_dim, padded_num_classes)"
    assert c_pad % _LANE == 0
    if num_classes is None:
        num_classes = c_pad

    tb, tn, w_buffers, vmem_limit = _plan_tiles(B, D, c_pad, x.dtype, w_t.dtype)
    if block_batch is not None:
        tb = block_batch
    if block_classes is not None:
        tn = block_classes

    return _linear_pallas(x, w_t, b_pad, tb=tb, tn=tn, w_buffers=w_buffers,
                          vmem_limit=vmem_limit, num_classes=num_classes)


if __name__ == "__main__":
    key = jax.random.PRNGKey(0)
    batch = 8
    input_dim = 32      # stand-in for xTrainTensor.shape[1]
    num_classes = 10

    kx, kw, kb = jax.random.split(key, 3)
    x = jax.random.normal(kx, (batch, input_dim), dtype=jnp.float32)
    # Deterministic parameter init (mimics nn.Linear's uniform(-1/sqrt(D), 1/sqrt(D)))
    bound = 1.0 / jnp.sqrt(jnp.float32(input_dim))
    weight = jax.random.uniform(kw, (num_classes, input_dim), jnp.float32,
                                minval=-bound, maxval=bound)
    bias = jax.random.uniform(kb, (num_classes,), jnp.float32,
                              minval=-bound, maxval=bound)

    ref = x @ weight.T + bias

    # Exact-precision path (f32 MXU feeds) -- strict check.
    w_t32, b_p32 = prepare_linear_params(weight, bias, compute_dtype=jnp.float32)
    out_f32 = linear_classifier_forward(x, w_t32, b_p32, num_classes)
    jax.block_until_ready(out_f32)
    assert out_f32.shape == (batch, num_classes)
    assert jnp.allclose(out_f32, ref, atol=1e-5, rtol=1e-5)

    # Default fast path (bf16 MXU feeds, f32 accumulation) -- bf16-level tolerance.
    w_t16, b_p16 = prepare_linear_params(weight, bias)   # bf16 weight
    out_bf16 = linear_classifier_forward(x, w_t16, b_p16, num_classes)
    jax.block_until_ready(out_bf16)
    assert out_bf16.shape == (batch, num_classes)
    assert jnp.allclose(out_bf16, ref, atol=3e-2, rtol=3e-2)

    print("KERNEL_OK")
</pallas_src>

<mosaic_0001>
module attributes {stable_mosaic.version = 11 : i64} {
  func.func @linear_kernel(%arg0: i32, %arg1: i32, %arg2: memref<8x32xf32, #tpu.memory_space<vmem>>, %arg3: memref<32x128xf32, #tpu.memory_space<vmem>>, %arg4: memref<1x128xf32, #tpu.memory_space<vmem>>, %arg5: memref<8x128xf32, #tpu.memory_space<vmem>>) attributes {dimension_semantics = [#tpu.dimension_semantics<parallel>, #tpu.dimension_semantics<parallel>], iteration_bounds = array<i64: 1, 1>, scalar_prefetch = 0 : i64, scratch_operands = 0 : i64, tpu.core_type = #tpu.core_type<tc>, window_params = [{transform_indices = @transform_0, window_bounds = array<i64: 8, 32>}, {pipeline_mode = #tpu.pipeline_mode<synchronous>, transform_indices = @transform_1, window_bounds = array<i64: 32, 128>}, {pipeline_mode = #tpu.pipeline_mode<synchronous>, transform_indices = @transform_2, window_bounds = array<i64: 1, 128>}, {transform_indices = @transform_3, window_bounds = array<i64: 8, 128>}]} {
    %c0 = arith.constant 0 : index
    %c0_0 = arith.constant 0 : index
    %0 = vector.load %arg3[%c0, %c0_0] : memref<32x128xf32, #tpu.memory_space<vmem>>, vector<32x128xf32>
    %c0_1 = arith.constant 0 : index
    %c0_2 = arith.constant 0 : index
    %1 = vector.load %arg2[%c0_1, %c0_2] : memref<8x32xf32, #tpu.memory_space<vmem>>, vector<8x32xf32>
    %cst = arith.constant dense<0.000000e+00> : vector<8x128xf32>
    %2 = tpu.matmul %1, %0, %cst {dimension_numbers = #tpu.dot_dimension_numbers<[1], [0], [0], [1], [0, 0, 1, 1], [], []>} : vector<8x32xf32>, vector<32x128xf32>, vector<8x128xf32> -> vector<8x128xf32>
    %c0_3 = arith.constant 0 : index
    %c0_4 = arith.constant 0 : index
    %3 = vector.load %arg4[%c0_3, %c0_4] : memref<1x128xf32, #tpu.memory_space<vmem>>, vector<1x128xf32>
    %4 = vector.broadcast %3 : vector<1x128xf32> to vector<8x128xf32>
    %5 = arith.addf %2, %4 : vector<8x128xf32>
    %c0_5 = arith.constant 0 : index
    %c0_6 = arith.constant 0 : index
    %6 = vector.load %arg5[%c0_5, %c0_6] : memref<8x128xf32, #tpu.memory_space<vmem>>, vector<8x128xf32>
    tpu.vector_store %arg5[%c0_5, %c0_6], %5 {strides = array<i32>} : memref<8x128xf32, #tpu.memory_space<vmem>>, vector<8x128xf32>,
    return
  }
  func.func @transform_0(%arg0: i32, %arg1: i32) -> (i32, i32) {
    %c0_i32 = arith.constant 0 : i32
    %c0_i32_0 = arith.constant 0 : i32
    return %arg0, %c0_i32 : i32, i32
  }
  func.func @transform_1(%arg0: i32, %arg1: i32) -> (i32, i32) {
    %c0_i32 = arith.constant 0 : i32
    %c0_i32_0 = arith.constant 0 : i32
    return %c0_i32, %arg1 : i32, i32
  }
  func.func @transform_2(%arg0: i32, %arg1: i32) -> (i32, i32) {
    %c0_i32 = arith.constant 0 : i32
    %c0_i32_0 = arith.constant 0 : i32
    return %c0_i32, %arg1 : i32, i32
  }
  func.func @transform_3(%arg0: i32, %arg1: i32) -> (i32, i32) {
    %c0_i32 = arith.constant 0 : i32
    return %arg0, %arg1 : i32, i32
  }
}

</mosaic_0001>

<bundles_post_ra>
// kernel: _linear_pallas.1
= control target key start
LH: loop header
LB: loop body
LE: loop exit
PB: predicated region body
PF: predicated region fallthrough
CT: control target
= control target key end

     0   :  { %8 = vsyncpa [#allocation3], 0  ;;  %s322_s0 = inlined_call_operand.hbm [shape: f32[8,32], index: 0, kind: input, shape index: {}]   ;;  %s323_s1 = inlined_call_operand.hbm [shape: f32[32,128], index: 1, kind: input, shape index: {}]   ;;  %s324_s2 = inlined_call_operand.vmem [shape: f32[1,128], index: 2, kind: input, shape index: {}]   ;;  %s325_s3 = inlined_call_operand.hbm [shape: f32[8,128], index: 3, kind: output, shape index: {}]  }
   0x1   :  { %9 = vsyncpa [#allocation6], 0 }
   0x2   :  { %10 = vsyncpa [#allocation4], 0  ;;  %s248_s12 = smov [#allocation2]   ;;  %s249_s14 = smov [#allocation5]  }
   0x3   :  { %s17_s13 = sshll.u32 %s248_s12, 4  ;;  %s26_s15 = sshll.u32 %s249_s14, 4  ;;  %s18_s13 = int_to_ptr.vmem [resolvable:$true] %s17_s13  ;;  %s276_s15 = int_to_ptr.vmem [resolvable:$true] %s26_s15 }
   0x4   :  { %s176_s18 = scalar_lea.hbm %s322_s0, 128 }
   0x5   :  { %p177_p0 = scmp.ne.s32.totalorder %s322_s0, %s176_s18  ;;  %p180_p1 = scmp.lt.u32.totalorder %s176_s18, %s322_s0 }
   0x7   :  { %p182_p2 = pnand %p180_p1, %p177_p0 }
   0x9   :  { %185 = shalt.err (!%p182_p2)
}
   0xa   :  { %s186_s23 = scalar_lea.vmem %s18_s13, 128  ;;  %p191_p4 = scmp.lt.s32.totalorder %s18_s13, %s18_s13 }
   0xb   :  { %p187_p3 = scmp.ne.s32.totalorder %s18_s13, %s186_s23  ;;  %p192_p5 = scmp.lt.s32.totalorder %s186_s23, %s186_s23 }
   0xd   :  { %p193_p6 = por %p192_p5, %p191_p4 }
   0xf   :  { %p194_p7 = pnand %p193_p6, %p187_p3 }
  0x11   :  { %197 = shalt.err (!%p194_p7)
}
  0x12   :  { %20 = dma.hbm_to_vmem [thread:$0]  %s322_s0, 128, %s18_s13, [#allocation3]  }
  0x13   :  { %s198_s28 = scalar_lea.hbm %s323_s1, 512 }
  0x14   :  { %p199_p8 = scmp.ne.s32.totalorder %s323_s1, %s198_s28  ;;  %p202_p9 = scmp.lt.u32.totalorder %s198_s28, %s323_s1 }
  0x16   :  { %p204_p10 = pnand %p202_p9, %p199_p8 }
  0x18   :  { %207 = shalt.err (!%p204_p10)
}
  0x19   :  { %s208_s6 = scalar_lea.vmem %s276_s15, 512  ;;  %p213_p12 = scmp.lt.s32.totalorder %s276_s15, %s276_s15 }
  0x1a   :  { %p209_p11 = scmp.ne.s32.totalorder %s276_s15, %s208_s6  ;;  %p214_p13 = scmp.lt.s32.totalorder %s208_s6, %s208_s6 }
  0x1c   :  { %p215_p0 = por %p214_p13, %p213_p12 }
  0x1e   :  { %p216_p1 = pnand %p215_p0, %p209_p11 }
  0x20   :  { %219 = shalt.err (!%p216_p1)
}
  0x21   :  { %s250_s0 = smov 128   ;;  %s251_s7 = smov 8  }
  0x22   :  { %32 = dma.hbm_to_vmem [thread:$0]  %s323_s1, 512, %s276_s15, [#allocation6], %s250_s0, %s250_s0, %s251_s7  }
  0x23   :  { %242 = dma.done.wait [#allocation3], 128  }
  0x24   :  { %243 = vsyncadd [#allocation3], 4294967168 }
  0x25   :  { %244 = dma.done.wait [#allocation6], 512  }
  0x26   :  { %245 = vsyncadd [#allocation6], 4294966784  ;;  %v252_v0 = vmov 0.0|0.0   ;;  %vm253_vm0 = vmmov 0   ;;  %v254_v1 = vmov 0.0   ;;  %v41_v2 = vld [vmem:[#allocation5] sm:$0xff] }
  0x27   :  { %162 = vmatprep.subr.bf16.mxu0 %v252_v0  ;;  %159 = vmatprep.mubr.msk.f32.mxu0 %vm253_vm0, %v254_v1  ;;  %v42_v3 = vld [vmem:[#allocation5 + $0x8] sm:$0xff]  ;;  %v43_v4 = vld [vmem:[#allocation5 + $0x10] sm:$0xff]  ;;  %v44_v6 = vld [vmem:[#allocation5 + $0x18] sm:$0xff]  ;;  %vm53_vm1 = vcmask 261120   ;;  %s255_s11 = smov [#allocation7]  }
  0x28   :  { %v163_v5 = vpack.c.bf16 %v42_v3, %v41_v2  ;;  %v166_v7 = vpack.c.bf16 %v44_v6, %v43_v4  ;;  %v45_v8 = vld [vmem:[#allocation2] sm:$0xff]  ;;  %s134_s12 = sshll.u32 %s255_s11, 4  ;;  %s135_s12 = int_to_ptr.vmem [resolvable:$true] %s134_s12 }
  0x29   :  { %v144_v9 = vld [vmem:[%s324_s2] ss:$0 sm:$0xff]  ;;  %s220_s13 = scalar_lea.vmem %s135_s12, 128  ;;  %p225_p3 = scmp.lt.s32.totalorder %s135_s12, %s135_s12 }
  0x2a   :  { %164 = vmatpush3.bf16.msra.mxu0 %v163_v5  ;;  %p221_p2 = scmp.ne.s32.totalorder %s135_s12, %s220_s13  ;;  %p226_p4 = scmp.lt.s32.totalorder %s220_s13, %s220_s13 }
  0x2b   :  { %165 = vmatprep.subr.bf16.mxu0 %v252_v0 }
  0x2c   :  { %p227_p5 = por %p226_p4, %p225_p3 }
  0x2e   :  { %167 = vmatpush3.bf16.msra.mxu0 %v166_v7  ;;  %p228_p6 = pnand %p227_p5, %p221_p2 }
  0x31   :  { %160 = vmatmul.mubr.msk.f32.vlgmr.msra.gmra.mrb[0].mxu0 %vm53_vm1, %v45_v8 }
 0x104   :  { %v123_v10 = vpop.f32.mrb[0].mxu0 }
 0x105   :  { %v124_v11 = vadd.f32 %v144_v9, %v123_v10  ;;  %v161_v12 = vpop.f32.mrb[1].mxu0 }
 0x107   :  { %127 = vst [vmem:[#allocation7] sm:$0xff] %v124_v11 }
 0x108   :  { %231 = shalt.err (!%p228_p6)
}
 0x109   :  { %s232_s16 = scalar_lea.hbm %s325_s3, 128 }
 0x10a   :  { %p233_p7 = scmp.ne.s32.totalorder %s325_s3, %s232_s16  ;;  %p236_p8 = scmp.lt.u32.totalorder %s232_s16, %s325_s3 }
 0x10c   :  { %p238_p9 = pnand %p236_p8, %p233_p7 }
 0x10e   :  { %241 = shalt.err (!%p238_p9)
}
 0x10f   :  { %137 = dma.vmem_to_hbm [thread:$0]  %s135_s12, 128, %s325_s3, [#allocation4]  }
 0x110   :  { %246 = dma.done.wait [#allocation4], 128  }
 0x111   :  { %247 = vsyncadd [#allocation4], 4294967168 }
 0x112   :  { %141 = vsyncpa [#allocation3], 1 }
 0x113   :  { %142 = vsyncpa [#allocation6], 1 }
 0x114   :  { %143 = vsyncpa [#allocation4], 1 }

</bundles_post_ra>
